<compile_context>
chip_gen: v6e
topology: v6e:2x2x1
jax: 0.10.0
libtpu: 0.0.40
codegen_flags: <defaults>
</compile_context>

<pallas_src>
import functools
import math

import jax
import jax.numpy as jnp
from jax import lax
from jax.experimental import pallas as pl
from jax.experimental.pallas import tpu as pltpu


# ----------------------------- Pallas kernel --------------------------------

def _fused_fusion_kernel(xd_ref, xr_ref, wqv_ref, wk_ref, wu_ref,
                         bq_ref, bk_ref, bv_ref, bu_ref, o_ref, *, bdim, psq):
    """Whole forward pass for one batch element; all intermediates in VMEM.

    xd_ref/xr_ref: (1, P, C, S) bf16 depth / rgb patch tokens (pi-major).
    wqv_ref: (2B, C) bf16 stacked Q (pre-scaled by 1/sqrt(L)) and V weights.
    wk_ref : (B, C)  bf16 K weights.      wu_ref: (C, B) bf16 output weights.
    bq/bk/bv_ref: (L, 1) f32 per-row biases (tiled to pi-major L ordering).
    bu_ref : (C, 1) f32 output bias.
    o_ref  : (1, P, C, S) f32 fused output (pi-major token layout).
    """
    B, P = bdim, psq
    f32, bf16 = jnp.float32, jnp.bfloat16

    wqv = wqv_ref[...]                                   # (2B, C) bf16
    wk = wk_ref[...]                                     # (B, C)  bf16

    # Per-intra-patch-offset projections: contraction over C only (no kron).
    q_blocks, k_blocks, v_blocks = [], [], []
    for pi in range(P):                                  # static unroll, P small
        xd = xd_ref[0, pi]                               # (C, S) bf16
        xr = xr_ref[0, pi]                               # (C, S) bf16
        qv = jnp.dot(wqv, xd, preferred_element_type=f32)    # (2B, S) f32 acc
        q_blocks.append(qv[:B])                          # 8-sublane aligned slice
        v_blocks.append(qv[B:])
        k_blocks.append(jnp.dot(wk, xr, preferred_element_type=f32))

    # Assemble (L, S) in pi-major ordering l = pi*B + b (blocks are full
    # 8-sublane tiles, so the concat is a pure tile placement).
    q = jnp.concatenate(q_blocks, axis=0) + bq_ref[...]  # (L, S) f32, scale folded
    k = jnp.concatenate(k_blocks, axis=0) + bk_ref[...]
    v = jnp.concatenate(v_blocks, axis=0) + bv_ref[...]

    # Scaled QK^T: contract the lane dims directly (no explicit k.T), bf16
    # operands / f32 accumulation on the MXU.
    s = lax.dot_general(q.astype(bf16), k.astype(bf16),
                        dimension_numbers=(((1,), (1,)), ((), ())),
                        preferred_element_type=f32)      # (L, L)

    # softmax(dim=2): max-subtracted, reciprocal on the otherwise-idle EUP.
    s = s - jnp.max(s, axis=-1, keepdims=True)
    e = jnp.exp(s)
    p_attn = e * pl.reciprocal(jnp.sum(e, axis=-1, keepdims=True), approx=True)

    out = jnp.dot(p_attn.astype(bf16), v.astype(bf16),
                  preferred_element_type=f32)            # (L, S) f32

    # Fused output 1x1 projection, block per intra-patch offset (same pi-major
    # ordering, so this exactly undoes the permutation).
    wu = wu_ref[...]                                     # (C, B) bf16
    bu = jnp.broadcast_to(bu_ref[...], (wu.shape[0], out.shape[1]))  # hoisted
    for pi in range(P):
        blk = out[pi * B:(pi + 1) * B, :].astype(bf16)   # aligned (B, S) slice
        o_ref[0, pi] = jnp.dot(wu, blk, preferred_element_type=f32) + bu


# ------------------------------ JAX glue -------------------------------------

def _flatten_pi_major(x, p):
    """(N,C,H,W) -> (N, P, C, S): tokens[n, i*p+j, c, hp*Wp+wp]."""
    N, C, H, W = x.shape
    Hp, Wp = H // p, W // p
    x = x.reshape(N, C, Hp, p, Wp, p)          # n, c, hp, i, wp, j
    x = x.transpose(0, 3, 5, 1, 2, 4)          # n, i, j, c, hp, wp
    return x.reshape(N, p * p, C, Hp * Wp)


def _unflatten_pi_major(y, p, out_shape):
    """(N, P, C, S) -> (N, C, H, W)  (PixelShuffle of the fused output)."""
    N, C, H, W = out_shape
    Hp, Wp = H // p, W // p
    y = y.reshape(N, p, p, C, Hp, Wp)          # n, i, j, c, hp, wp
    y = y.transpose(0, 3, 4, 1, 5, 2)          # n, c, hp, i, wp, j
    return y.reshape(N, C, H, W)


def mh_attention_fusion_third(rgb, depth, params, patches_size):
    N, C, H, W = rgb.shape
    p = patches_size
    P = p * p
    B = params["wq"].shape[0]                  # bottleneck_dim
    L = P * B                                  # latent_patch_dim
    S = (H // p) * (W // p)
    inv_scale = 1.0 / math.sqrt(float(L))

    bf16, f32 = jnp.bfloat16, jnp.float32

    # Tokens in intra-patch-offset-major layout; bf16 operands for the MXU.
    xd = _flatten_pi_major(depth, p).astype(bf16)        # (N, P, C, S)
    xr = _flatten_pi_major(rgb, p).astype(bf16)

    # Small weights only (no kron).  1/sqrt(L) folded into the Q half; Q and V
    # stacked so the kernel does one matmul per intra-patch offset for both.
    wqv = jnp.concatenate([params["wq"] * inv_scale, params["wv"]],
                          axis=0).astype(bf16)           # (2B, C)
    wk = params["wk"].astype(bf16)                       # (B, C)
    wu = params["wu"].astype(bf16)                       # (C, B)
    # Biases tiled to the kernel's pi-major L ordering (l = pi*B + b).
    bq = jnp.tile(params["bq"] * inv_scale, P).reshape(L, 1).astype(f32)
    bk = jnp.tile(params["bk"], P).reshape(L, 1).astype(f32)
    bv = jnp.tile(params["bv"], P).reshape(L, 1).astype(f32)
    bu = params["bu"].reshape(C, 1).astype(f32)

    kern = functools.partial(_fused_fusion_kernel, bdim=B, psq=P)
    tok_spec = pl.BlockSpec((1, P, C, S), lambda n: (n, 0, 0, 0))

    def full_spec(shape):
        return pl.BlockSpec(shape, lambda n, _s=shape: (0,) * len(_s))

    out_tok = pl.pallas_call(
        kern,
        out_shape=jax.ShapeDtypeStruct((N, P, C, S), f32),
        grid=(N,),
        in_specs=[
            tok_spec,                     # depth tokens
            tok_spec,                     # rgb tokens
            full_spec((2 * B, C)),        # wqv
            full_spec((B, C)),            # wk
            full_spec((C, B)),            # wu
            full_spec((L, 1)),            # bq (scaled, tiled)
            full_spec((L, 1)),            # bk
            full_spec((L, 1)),            # bv
            full_spec((C, 1)),            # bu
        ],
        out_specs=tok_spec,
        compiler_params=pltpu.CompilerParams(
            dimension_semantics=("parallel",)),   # v7x: 2 TCs over batch
    )(xd, xr, wqv, wk, wu, bq, bk, bv, bu)

    return _unflatten_pi_major(out_tok, p, (N, C, H, W))


# --------------------------- pure-JAX reference ------------------------------

def vit_flatten(x, p):
    N, C, H, W = x.shape
    x = x.reshape(N, C, H // p, p, W // p, p)
    x = x.transpose(0, 1, 3, 5, 2, 4)
    return x.reshape(N, C * p * p, (H // p) * (W // p))


def vit_unflatten(x, p, out_shape):
    N, C, H, W = out_shape
    x = x.reshape(N, C, p, p, H // p, W // p)
    x = x.transpose(0, 1, 4, 2, 5, 3)
    return x.reshape(N, C, H, W)


def reference(rgb, depth, params, p):
    def c1(x, w, b):
        return jnp.einsum("oc,nchw->nohw", w, x) + b[None, :, None, None]

    B = params["wq"].shape[0]
    L = p * p * B
    scale = math.sqrt(float(L))
    q = c1(depth, params["wq"], params["bq"])
    k = c1(rgb, params["wk"], params["bk"])
    v = c1(depth, params["wv"], params["bv"])
    fq, fk, fv = (vit_flatten(t, p) for t in (q, k, v))
    s = jnp.einsum("nls,nms->nlm", fq, fk) / scale
    a = jax.nn.softmax(s, axis=2)
    out = jnp.einsum("nlm,nms->nls", a, fv)
    out = vit_unflatten(out, p, q.shape)
    return c1(out, params["wu"], params["bu"])


# --------------------------------- main --------------------------------------

if __name__ == "__main__":
    N, C, H, W = 2, 4, 16, 16       # small NCHW inputs
    patches_size = 2
    bottleneck_dim = 8

    key = jax.random.PRNGKey(0)
    ks = jax.random.split(key, 10)
    rgb = jax.random.normal(ks[0], (N, C, H, W), jnp.float32)
    depth = jax.random.normal(ks[1], (N, C, H, W), jnp.float32)

    params = {
        "wq": 0.25 * jax.random.normal(ks[2], (bottleneck_dim, C), jnp.float32),
        "bq": 0.25 * jax.random.normal(ks[3], (bottleneck_dim,), jnp.float32),
        "wk": 0.25 * jax.random.normal(ks[4], (bottleneck_dim, C), jnp.float32),
        "bk": 0.25 * jax.random.normal(ks[5], (bottleneck_dim,), jnp.float32),
        "wv": 0.25 * jax.random.normal(ks[6], (bottleneck_dim, C), jnp.float32),
        "bv": 0.25 * jax.random.normal(ks[7], (bottleneck_dim,), jnp.float32),
        "wu": 0.25 * jax.random.normal(ks[8], (C, bottleneck_dim), jnp.float32),
        "bu": 0.25 * jax.random.normal(ks[9], (C,), jnp.float32),
    }

    out = mh_attention_fusion_third(rgb, depth, params, patches_size)
    out = jax.block_until_ready(out)

    ref = reference(rgb, depth, params, patches_size)
    assert out.shape == (N, C, H, W)
    # Tolerance accounts for bf16 MXU operands + EUP approximate reciprocal in
    # the softmax denominator (f32 reference).
    assert jnp.allclose(out, ref, atol=2e-2, rtol=2e-2), "mismatch vs reference"

    print("KERNEL_OK")
</pallas_src>

<mosaic_0001>
module attributes {stable_mosaic.version = 11 : i64} {
  func.func @_fused_fusion_kernel(%arg0: i32, %arg1: memref<1x4x4x64xbf16, #tpu.memory_space<vmem>>, %arg2: memref<1x4x4x64xbf16, #tpu.memory_space<vmem>>, %arg3: memref<16x4xbf16, #tpu.memory_space<vmem>>, %arg4: memref<8x4xbf16, #tpu.memory_space<vmem>>, %arg5: memref<4x8xbf16, #tpu.memory_space<vmem>>, %arg6: memref<32x1xf32, #tpu.memory_space<vmem>>, %arg7: memref<32x1xf32, #tpu.memory_space<vmem>>, %arg8: memref<32x1xf32, #tpu.memory_space<vmem>>, %arg9: memref<4x1xf32, #tpu.memory_space<vmem>>, %arg10: memref<1x4x4x64xf32, #tpu.memory_space<vmem>>) attributes {dimension_semantics = [#tpu.dimension_semantics<parallel>], iteration_bounds = array<i64: 2>, scalar_prefetch = 0 : i64, scratch_operands = 0 : i64, tpu.core_type = #tpu.core_type<tc>, window_params = [{transform_indices = @transform_0, window_bounds = array<i64: 1, 4, 4, 64>}, {transform_indices = @transform_1, window_bounds = array<i64: 1, 4, 4, 64>}, {pipeline_mode = #tpu.pipeline_mode<synchronous>, transform_indices = @transform_2, window_bounds = array<i64: 16, 4>}, {pipeline_mode = #tpu.pipeline_mode<synchronous>, transform_indices = @transform_3, window_bounds = array<i64: 8, 4>}, {pipeline_mode = #tpu.pipeline_mode<synchronous>, transform_indices = @transform_4, window_bounds = array<i64: 4, 8>}, {pipeline_mode = #tpu.pipeline_mode<synchronous>, transform_indices = @transform_5, window_bounds = array<i64: 32, 1>}, {pipeline_mode = #tpu.pipeline_mode<synchronous>, transform_indices = @transform_6, window_bounds = array<i64: 32, 1>}, {pipeline_mode = #tpu.pipeline_mode<synchronous>, transform_indices = @transform_7, window_bounds = array<i64: 32, 1>}, {pipeline_mode = #tpu.pipeline_mode<synchronous>, transform_indices = @transform_8, window_bounds = array<i64: 4, 1>}, {transform_indices = @transform_9, window_bounds = array<i64: 1, 4, 4, 64>}]} {
    %c0 = arith.constant 0 : index
    %c0_0 = arith.constant 0 : index
    %0 = vector.load %arg3[%c0, %c0_0] : memref<16x4xbf16, #tpu.memory_space<vmem>>, vector<16x4xbf16>
    %c0_1 = arith.constant 0 : index
    %c0_2 = arith.constant 0 : index
    %1 = vector.load %arg4[%c0_1, %c0_2] : memref<8x4xbf16, #tpu.memory_space<vmem>>, vector<8x4xbf16>
    %c0_3 = arith.constant 0 : index
    %c0_4 = arith.constant 0 : index
    %c0_5 = arith.constant 0 : index
    %c0_6 = arith.constant 0 : index
    %2 = vector.load %arg1[%c0_3, %c0_4, %c0_5, %c0_6] : memref<1x4x4x64xbf16, #tpu.memory_space<vmem>>, vector<1x1x4x64xbf16>
    %3 = vector.shape_cast %2 : vector<1x1x4x64xbf16> to vector<4x64xbf16>
    %c0_7 = arith.constant 0 : index
    %c0_8 = arith.constant 0 : index
    %c0_9 = arith.constant 0 : index
    %c0_10 = arith.constant 0 : index
    %4 = vector.load %arg2[%c0_7, %c0_8, %c0_9, %c0_10] : memref<1x4x4x64xbf16, #tpu.memory_space<vmem>>, vector<1x1x4x64xbf16>
    %5 = vector.shape_cast %4 : vector<1x1x4x64xbf16> to vector<4x64xbf16>
    %cst = arith.constant dense<0.000000e+00> : vector<16x64xf32>
    %6 = tpu.matmul %0, %3, %cst {dimension_numbers = #tpu.dot_dimension_numbers<[1], [0], [0], [1], [0, 0, 1, 1], [], []>} : vector<16x4xbf16>, vector<4x64xbf16>, vector<16x64xf32> -> vector<16x64xf32>
    %7 = vector.extract_strided_slice %6 {offsets = [0, 0], sizes = [8, 64], strides = [1, 1]} : vector<16x64xf32> to vector<8x64xf32>
    %8 = vector.extract_strided_slice %6 {offsets = [8, 0], sizes = [8, 64], strides = [1, 1]} : vector<16x64xf32> to vector<8x64xf32>
    %cst_11 = arith.constant dense<0.000000e+00> : vector<8x64xf32>
    %9 = tpu.matmul %1, %5, %cst_11 {dimension_numbers = #tpu.dot_dimension_numbers<[1], [0], [0], [1], [0, 0, 1, 1], [], []>} : vector<8x4xbf16>, vector<4x64xbf16>, vector<8x64xf32> -> vector<8x64xf32>
    %c0_12 = arith.constant 0 : index
    %c1 = arith.constant 1 : index
    %c0_13 = arith.constant 0 : index
    %c0_14 = arith.constant 0 : index
    %10 = vector.load %arg1[%c0_12, %c1, %c0_13, %c0_14] : memref<1x4x4x64xbf16, #tpu.memory_space<vmem>>, vector<1x1x4x64xbf16>
    %11 = vector.shape_cast %10 : vector<1x1x4x64xbf16> to vector<4x64xbf16>
    %c0_15 = arith.constant 0 : index
    %c1_16 = arith.constant 1 : index
    %c0_17 = arith.constant 0 : index
    %c0_18 = arith.constant 0 : index
    %12 = vector.load %arg2[%c0_15, %c1_16, %c0_17, %c0_18] : memref<1x4x4x64xbf16, #tpu.memory_space<vmem>>, vector<1x1x4x64xbf16>
    %13 = vector.shape_cast %12 : vector<1x1x4x64xbf16> to vector<4x64xbf16>
    %cst_19 = arith.constant dense<0.000000e+00> : vector<16x64xf32>
    %14 = tpu.matmul %0, %11, %cst_19 {dimension_numbers = #tpu.dot_dimension_numbers<[1], [0], [0], [1], [0, 0, 1, 1], [], []>} : vector<16x4xbf16>, vector<4x64xbf16>, vector<16x64xf32> -> vector<16x64xf32>
    %15 = vector.extract_strided_slice %14 {offsets = [0, 0], sizes = [8, 64], strides = [1, 1]} : vector<16x64xf32> to vector<8x64xf32>
    %16 = vector.extract_strided_slice %14 {offsets = [8, 0], sizes = [8, 64], strides = [1, 1]} : vector<16x64xf32> to vector<8x64xf32>
    %cst_20 = arith.constant dense<0.000000e+00> : vector<8x64xf32>
    %17 = tpu.matmul %1, %13, %cst_20 {dimension_numbers = #tpu.dot_dimension_numbers<[1], [0], [0], [1], [0, 0, 1, 1], [], []>} : vector<8x4xbf16>, vector<4x64xbf16>, vector<8x64xf32> -> vector<8x64xf32>
    %c0_21 = arith.constant 0 : index
    %c2 = arith.constant 2 : index
    %c0_22 = arith.constant 0 : index
    %c0_23 = arith.constant 0 : index
    %18 = vector.load %arg1[%c0_21, %c2, %c0_22, %c0_23] : memref<1x4x4x64xbf16, #tpu.memory_space<vmem>>, vector<1x1x4x64xbf16>
    %19 = vector.shape_cast %18 : vector<1x1x4x64xbf16> to vector<4x64xbf16>
    %c0_24 = arith.constant 0 : index
    %c2_25 = arith.constant 2 : index
    %c0_26 = arith.constant 0 : index
    %c0_27 = arith.constant 0 : index
    %20 = vector.load %arg2[%c0_24, %c2_25, %c0_26, %c0_27] : memref<1x4x4x64xbf16, #tpu.memory_space<vmem>>, vector<1x1x4x64xbf16>
    %21 = vector.shape_cast %20 : vector<1x1x4x64xbf16> to vector<4x64xbf16>
    %cst_28 = arith.constant dense<0.000000e+00> : vector<16x64xf32>
    %22 = tpu.matmul %0, %19, %cst_28 {dimension_numbers = #tpu.dot_dimension_numbers<[1], [0], [0], [1], [0, 0, 1, 1], [], []>} : vector<16x4xbf16>, vector<4x64xbf16>, vector<16x64xf32> -> vector<16x64xf32>
    %23 = vector.extract_strided_slice %22 {offsets = [0, 0], sizes = [8, 64], strides = [1, 1]} : vector<16x64xf32> to vector<8x64xf32>
    %24 = vector.extract_strided_slice %22 {offsets = [8, 0], sizes = [8, 64], strides = [1, 1]} : vector<16x64xf32> to vector<8x64xf32>
    %cst_29 = arith.constant dense<0.000000e+00> : vector<8x64xf32>
    %25 = tpu.matmul %1, %21, %cst_29 {dimension_numbers = #tpu.dot_dimension_numbers<[1], [0], [0], [1], [0, 0, 1, 1], [], []>} : vector<8x4xbf16>, vector<4x64xbf16>, vector<8x64xf32> -> vector<8x64xf32>
    %c0_30 = arith.constant 0 : index
    %c3 = arith.constant 3 : index
    %c0_31 = arith.constant 0 : index
    %c0_32 = arith.constant 0 : index
    %26 = vector.load %arg1[%c0_30, %c3, %c0_31, %c0_32] : memref<1x4x4x64xbf16, #tpu.memory_space<vmem>>, vector<1x1x4x64xbf16>
    %27 = vector.shape_cast %26 : vector<1x1x4x64xbf16> to vector<4x64xbf16>
    %c0_33 = arith.constant 0 : index
    %c3_34 = arith.constant 3 : index
    %c0_35 = arith.constant 0 : index
    %c0_36 = arith.constant 0 : index
    %28 = vector.load %arg2[%c0_33, %c3_34, %c0_35, %c0_36] : memref<1x4x4x64xbf16, #tpu.memory_space<vmem>>, vector<1x1x4x64xbf16>
    %29 = vector.shape_cast %28 : vector<1x1x4x64xbf16> to vector<4x64xbf16>
    %cst_37 = arith.constant dense<0.000000e+00> : vector<16x64xf32>
    %30 = tpu.matmul %0, %27, %cst_37 {dimension_numbers = #tpu.dot_dimension_numbers<[1], [0], [0], [1], [0, 0, 1, 1], [], []>} : vector<16x4xbf16>, vector<4x64xbf16>, vector<16x64xf32> -> vector<16x64xf32>
    %31 = vector.extract_strided_slice %30 {offsets = [0, 0], sizes = [8, 64], strides = [1, 1]} : vector<16x64xf32> to vector<8x64xf32>
    %32 = vector.extract_strided_slice %30 {offsets = [8, 0], sizes = [8, 64], strides = [1, 1]} : vector<16x64xf32> to vector<8x64xf32>
    %cst_38 = arith.constant dense<0.000000e+00> : vector<8x64xf32>
    %33 = tpu.matmul %1, %29, %cst_38 {dimension_numbers = #tpu.dot_dimension_numbers<[1], [0], [0], [1], [0, 0, 1, 1], [], []>} : vector<8x4xbf16>, vector<4x64xbf16>, vector<8x64xf32> -> vector<8x64xf32>
    %34 = tpu.concatenate %7, %15, %23, %31 in 0 : vector<8x64xf32>, vector<8x64xf32>, vector<8x64xf32>, vector<8x64xf32> -> vector<32x64xf32>
    %c0_39 = arith.constant 0 : index
    %c0_40 = arith.constant 0 : index
    %35 = vector.load %arg6[%c0_39, %c0_40] : memref<32x1xf32, #tpu.memory_space<vmem>>, vector<32x1xf32>
    %36 = vector.broadcast %35 : vector<32x1xf32> to vector<32x64xf32>
    %37 = arith.addf %34, %36 : vector<32x64xf32>
    %38 = tpu.concatenate %9, %17, %25, %33 in 0 : vector<8x64xf32>, vector<8x64xf32>, vector<8x64xf32>, vector<8x64xf32> -> vector<32x64xf32>
    %c0_41 = arith.constant 0 : index
    %c0_42 = arith.constant 0 : index
    %39 = vector.load %arg7[%c0_41, %c0_42] : memref<32x1xf32, #tpu.memory_space<vmem>>, vector<32x1xf32>
    %40 = vector.broadcast %39 : vector<32x1xf32> to vector<32x64xf32>
    %41 = arith.addf %38, %40 : vector<32x64xf32>
    %42 = tpu.concatenate %8, %16, %24, %32 in 0 : vector<8x64xf32>, vector<8x64xf32>, vector<8x64xf32>, vector<8x64xf32> -> vector<32x64xf32>
    %c0_43 = arith.constant 0 : index
    %c0_44 = arith.constant 0 : index
    %43 = vector.load %arg8[%c0_43, %c0_44] : memref<32x1xf32, #tpu.memory_space<vmem>>, vector<32x1xf32>
    %44 = vector.broadcast %43 : vector<32x1xf32> to vector<32x64xf32>
    %45 = arith.addf %42, %44 : vector<32x64xf32>
    %46 = arith.truncf %37 : vector<32x64xf32> to vector<32x64xbf16>
    %47 = arith.truncf %41 : vector<32x64xf32> to vector<32x64xbf16>
    %cst_45 = arith.constant dense<0.000000e+00> : vector<32x32xf32>
    %48 = tpu.matmul %46, %47, %cst_45 {dimension_numbers = #tpu.dot_dimension_numbers<[1], [1], [0], [0], [0, 0, 1, 0], [], []>} : vector<32x64xbf16>, vector<32x64xbf16>, vector<32x32xf32> -> vector<32x32xf32>
    %cst_46 = arith.constant dense<0xFF800000> : vector<32xf32>
    %49 = vector.multi_reduction <maximumf>, %48, %cst_46 [1] : vector<32x32xf32> to vector<32xf32>
    %50 = vector.shape_cast %49 : vector<32xf32> to vector<32x1xf32>
    %51 = vector.broadcast %50 : vector<32x1xf32> to vector<32x32xf32>
    %52 = arith.subf %48, %51 : vector<32x32xf32>
    %53 = math.exp %52 : vector<32x32xf32>
    %cst_47 = arith.constant dense<0.000000e+00> : vector<32xf32>
    %54 = vector.multi_reduction <add>, %53, %cst_47 [1] : vector<32x32xf32> to vector<32xf32>
    %55 = vector.shape_cast %54 : vector<32xf32> to vector<32x1xf32>
    %56 = tpu.reciprocal %55 {approx = true} : vector<32x1xf32> -> vector<32x1xf32>
    %57 = vector.broadcast %56 : vector<32x1xf32> to vector<32x32xf32>
    %58 = arith.mulf %53, %57 : vector<32x32xf32>
    %59 = arith.truncf %58 : vector<32x32xf32> to vector<32x32xbf16>
    %60 = arith.truncf %45 : vector<32x64xf32> to vector<32x64xbf16>
    %cst_48 = arith.constant dense<0.000000e+00> : vector<32x64xf32>
    %61 = tpu.matmul %59, %60, %cst_48 {dimension_numbers = #tpu.dot_dimension_numbers<[1], [0], [0], [1], [0, 0, 1, 1], [], []>} : vector<32x32xbf16>, vector<32x64xbf16>, vector<32x64xf32> -> vector<32x64xf32>
    %c0_49 = arith.constant 0 : index
    %c0_50 = arith.constant 0 : index
    %62 = vector.load %arg5[%c0_49, %c0_50] : memref<4x8xbf16, #tpu.memory_space<vmem>>, vector<4x8xbf16>
    %c0_51 = arith.constant 0 : index
    %c0_52 = arith.constant 0 : index
    %63 = vector.load %arg9[%c0_51, %c0_52] : memref<4x1xf32, #tpu.memory_space<vmem>>, vector<4x1xf32>
    %64 = vector.shape_cast %63 : vector<4x1xf32> to vector<4x1xf32>
    %65 = vector.broadcast %64 : vector<4x1xf32> to vector<4x64xf32>
    %66 = vector.extract_strided_slice %61 {offsets = [0, 0], sizes = [8, 64], strides = [1, 1]} : vector<32x64xf32> to vector<8x64xf32>
    %67 = arith.truncf %66 : vector<8x64xf32> to vector<8x64xbf16>
    %cst_53 = arith.constant dense<0.000000e+00> : vector<4x64xf32>
    %68 = tpu.matmul %62, %67, %cst_53 {dimension_numbers = #tpu.dot_dimension_numbers<[1], [0], [0], [1], [0, 0, 1, 1], [], []>} : vector<4x8xbf16>, vector<8x64xbf16>, vector<4x64xf32> -> vector<4x64xf32>
    %69 = arith.addf %68, %65 : vector<4x64xf32>
    %c0_54 = arith.constant 0 : index
    %c0_55 = arith.constant 0 : index
    %c0_56 = arith.constant 0 : index
    %c0_57 = arith.constant 0 : index
    %70 = vector.load %arg10[%c0_54, %c0_55, %c0_56, %c0_57] : memref<1x4x4x64xf32, #tpu.memory_space<vmem>>, vector<1x1x4x64xf32>
    %71 = vector.shape_cast %70 : vector<1x1x4x64xf32> to vector<4x64xf32>
    %72 = vector.shape_cast %69 : vector<4x64xf32> to vector<1x1x4x64xf32>
    tpu.vector_store %arg10[%c0_54, %c0_55, %c0_56, %c0_57], %72 {strides = array<i32>} : memref<1x4x4x64xf32, #tpu.memory_space<vmem>>, vector<1x1x4x64xf32>,
    %73 = vector.extract_strided_slice %61 {offsets = [8, 0], sizes = [8, 64], strides = [1, 1]} : vector<32x64xf32> to vector<8x64xf32>
    %74 = arith.truncf %73 : vector<8x64xf32> to vector<8x64xbf16>
    %cst_58 = arith.constant dense<0.000000e+00> : vector<4x64xf32>
    %75 = tpu.matmul %62, %74, %cst_58 {dimension_numbers = #tpu.dot_dimension_numbers<[1], [0], [0], [1], [0, 0, 1, 1], [], []>} : vector<4x8xbf16>, vector<8x64xbf16>, vector<4x64xf32> -> vector<4x64xf32>
    %76 = arith.addf %75, %65 : vector<4x64xf32>
    %c0_59 = arith.constant 0 : index
    %c1_60 = arith.constant 1 : index
    %c0_61 = arith.constant 0 : index
    %c0_62 = arith.constant 0 : index
    %77 = vector.load %arg10[%c0_59, %c1_60, %c0_61, %c0_62] : memref<1x4x4x64xf32, #tpu.memory_space<vmem>>, vector<1x1x4x64xf32>
    %78 = vector.shape_cast %77 : vector<1x1x4x64xf32> to vector<4x64xf32>
    %79 = vector.shape_cast %76 : vector<4x64xf32> to vector<1x1x4x64xf32>
    tpu.vector_store %arg10[%c0_59, %c1_60, %c0_61, %c0_62], %79 {strides = array<i32>} : memref<1x4x4x64xf32, #tpu.memory_space<vmem>>, vector<1x1x4x64xf32>,
    %80 = vector.extract_strided_slice %61 {offsets = [16, 0], sizes = [8, 64], strides = [1, 1]} : vector<32x64xf32> to vector<8x64xf32>
    %81 = arith.truncf %80 : vector<8x64xf32> to vector<8x64xbf16>
    %cst_63 = arith.constant dense<0.000000e+00> : vector<4x64xf32>
    %82 = tpu.matmul %62, %81, %cst_63 {dimension_numbers = #tpu.dot_dimension_numbers<[1], [0], [0], [1], [0, 0, 1, 1], [], []>} : vector<4x8xbf16>, vector<8x64xbf16>, vector<4x64xf32> -> vector<4x64xf32>
    %83 = arith.addf %82, %65 : vector<4x64xf32>
    %c0_64 = arith.constant 0 : index
    %c2_65 = arith.constant 2 : index
    %c0_66 = arith.constant 0 : index
    %c0_67 = arith.constant 0 : index
    %84 = vector.load %arg10[%c0_64, %c2_65, %c0_66, %c0_67] : memref<1x4x4x64xf32, #tpu.memory_space<vmem>>, vector<1x1x4x64xf32>
    %85 = vector.shape_cast %84 : vector<1x1x4x64xf32> to vector<4x64xf32>
    %86 = vector.shape_cast %83 : vector<4x64xf32> to vector<1x1x4x64xf32>
    tpu.vector_store %arg10[%c0_64, %c2_65, %c0_66, %c0_67], %86 {strides = array<i32>} : memref<1x4x4x64xf32, #tpu.memory_space<vmem>>, vector<1x1x4x64xf32>,
    %87 = vector.extract_strided_slice %61 {offsets = [24, 0], sizes = [8, 64], strides = [1, 1]} : vector<32x64xf32> to vector<8x64xf32>
    %88 = arith.truncf %87 : vector<8x64xf32> to vector<8x64xbf16>
    %cst_68 = arith.constant dense<0.000000e+00> : vector<4x64xf32>
    %89 = tpu.matmul %62, %88, %cst_68 {dimension_numbers = #tpu.dot_dimension_numbers<[1], [0], [0], [1], [0, 0, 1, 1], [], []>} : vector<4x8xbf16>, vector<8x64xbf16>, vector<4x64xf32> -> vector<4x64xf32>
    %90 = arith.addf %89, %65 : vector<4x64xf32>
    %c0_69 = arith.constant 0 : index
    %c3_70 = arith.constant 3 : index
    %c0_71 = arith.constant 0 : index
    %c0_72 = arith.constant 0 : index
    %91 = vector.load %arg10[%c0_69, %c3_70, %c0_71, %c0_72] : memref<1x4x4x64xf32, #tpu.memory_space<vmem>>, vector<1x1x4x64xf32>
    %92 = vector.shape_cast %91 : vector<1x1x4x64xf32> to vector<4x64xf32>
    %93 = vector.shape_cast %90 : vector<4x64xf32> to vector<1x1x4x64xf32>
    tpu.vector_store %arg10[%c0_69, %c3_70, %c0_71, %c0_72], %93 {strides = array<i32>} : memref<1x4x4x64xf32, #tpu.memory_space<vmem>>, vector<1x1x4x64xf32>,
    return
  }
  func.func @transform_0(%arg0: i32) -> (i32, i32, i32, i32) {
    %c0_i32 = arith.constant 0 : i32
    %c0_i32_0 = arith.constant 0 : i32
    %c0_i32_1 = arith.constant 0 : i32
    %c0_i32_2 = arith.constant 0 : i32
    return %arg0, %c0_i32, %c0_i32_0, %c0_i32_1 : i32, i32, i32, i32
  }
  func.func @transform_1(%arg0: i32) -> (i32, i32, i32, i32) {
    %c0_i32 = arith.constant 0 : i32
    %c0_i32_0 = arith.constant 0 : i32
    %c0_i32_1 = arith.constant 0 : i32
    %c0_i32_2 = arith.constant 0 : i32
    return %arg0, %c0_i32, %c0_i32_0, %c0_i32_1 : i32, i32, i32, i32
  }
  func.func @transform_2(%arg0: i32) -> (i32, i32) {
    %c0_i32 = arith.constant 0 : i32
    %c0_i32_0 = arith.constant 0 : i32
    %c0_i32_1 = arith.constant 0 : i32
    return %c0_i32, %c0_i32_0 : i32, i32
  }
  func.func @transform_3(%arg0: i32) -> (i32, i32) {
    %c0_i32 = arith.constant 0 : i32
    %c0_i32_0 = arith.constant 0 : i32
    %c0_i32_1 = arith.constant 0 : i32
    return %c0_i32, %c0_i32_0 : i32, i32
  }
  func.func @transform_4(%arg0: i32) -> (i32, i32) {
    %c0_i32 = arith.constant 0 : i32
    %c0_i32_0 = arith.constant 0 : i32
    %c0_i32_1 = arith.constant 0 : i32
    return %c0_i32, %c0_i32_0 : i32, i32
  }
  func.func @transform_5(%arg0: i32) -> (i32, i32) {
    %c0_i32 = arith.constant 0 : i32
    %c0_i32_0 = arith.constant 0 : i32
    %c0_i32_1 = arith.constant 0 : i32
    return %c0_i32, %c0_i32_0 : i32, i32
  }
  func.func @transform_6(%arg0: i32) -> (i32, i32) {
    %c0_i32 = arith.constant 0 : i32
    %c0_i32_0 = arith.constant 0 : i32
    %c0_i32_1 = arith.constant 0 : i32
    return %c0_i32, %c0_i32_0 : i32, i32
  }
  func.func @transform_7(%arg0: i32) -> (i32, i32) {
    %c0_i32 = arith.constant 0 : i32
    %c0_i32_0 = arith.constant 0 : i32
    %c0_i32_1 = arith.constant 0 : i32
    return %c0_i32, %c0_i32_0 : i32, i32
  }
  func.func @transform_8(%arg0: i32) -> (i32, i32) {
    %c0_i32 = arith.constant 0 : i32
    %c0_i32_0 = arith.constant 0 : i32
    %c0_i32_1 = arith.constant 0 : i32
    return %c0_i32, %c0_i32_0 : i32, i32
  }
  func.func @transform_9(%arg0: i32) -> (i32, i32, i32, i32) {
    %c0_i32 = arith.constant 0 : i32
    %c0_i32_0 = arith.constant 0 : i32
    %c0_i32_1 = arith.constant 0 : i32
    %c0_i32_2 = arith.constant 0 : i32
    return %arg0, %c0_i32, %c0_i32_0, %c0_i32_1 : i32, i32, i32, i32
  }
}

</mosaic_0001>

<bundles_post_ra>
// kernel: tpu_custom_call.1
= control target key start
LH: loop header
LB: loop body
LE: loop exit
PB: predicated region body
PF: predicated region fallthrough
CT: control target
= control target key end

     0   :  { %14 = vsyncpa [#allocation3], 0  ;;  %s1875_s0 = inlined_call_operand.vmem [shape: bf16[2,4,4,64], index: 0, kind: input, shape index: {}]   ;;  %s1876_s1 = inlined_call_operand.vmem [shape: bf16[2,4,4,64], index: 1, kind: input, shape index: {}]   ;;  %s1877_s2 = inlined_call_operand.vmem [shape: bf16[16,4], index: 2, kind: input, shape index: {}]   ;;  %s1878_s3 = inlined_call_operand.vmem [shape: bf16[8,4], index: 3, kind: input, shape index: {}]   ;;  %s1879_s4 = inlined_call_operand.vmem [shape: bf16[4,8], index: 4, kind: input, shape index: {}]   ;;  %s1880_s5 = inlined_call_operand.vmem [shape: f32[32,1], index: 5, kind: input, shape index: {}]   ;;  %s1881_s6 = inlined_call_operand.vmem [shape: f32[32,1], index: 6, kind: input, shape index: {}]   ;;  %s1882_s7 = inlined_call_operand.vmem [shape: f32[32,1], index: 7, kind: input, shape index: {}]   ;;  %s1883_s8 = inlined_call_operand.vmem [shape: f32[4,1], index: 8, kind: input, shape index: {}]   ;;  %s1884_s9 = inlined_call_operand.hbm [shape: f32[2,4,4,64], index: 9, kind: output, shape index: {}]  }
   0x1   :  { %16 = vsyncpa [#allocation3 + $0x1], 0  ;;  %s1614_s30 = smov 0   ;;  %s1616_s10 = smov 0  }
   0x2   :  { %s1618_s11 = smov 0   ;;  %s1620_s12 = smov 0  }
   0x3 LB: > { %s1635_s13 = sadd.s32 4294967295, %s1556_s12   ;;  %s1268_s14 = sadd.s32 4294967294, %s1556_s12   ;;  %s1556_s12 = sphi %s1620_s12, %s1890_s12   ;;  %s1552_s11 = sphi %s1618_s11, %s1889_s11   ;;  %s1548_s10 = sphi %s1616_s10, %s1888_s10   ;;  %s1544_s30 = sphi %s1614_s30, %s1887_s30  }
   0x4   : > { %s1639_s15 = sadd.s32 1, %s1556_s12   ;;  %s228_s16 = sadd.s32 1, %s1552_s11 }
   0x5   : > { %s225_s17 = ssub.s32 %s1556_s12, %s1639_s15  ;;  %p238_p0 = scmp.ne.s32.totalorder %s1552_s11, %s1548_s10 }
   0x6   : > { %p226_p1 = scmp.eq.s32.totalorder %s225_s17, 0  ;;  %p239_p2 = scmp.eq.s32.totalorder %s1635_s13, 1 }
   0x7   : > { %p244_p3 = scmp.ne.s32.totalorder %s1548_s10, %s1544_s30  ;;  %p245_p4 = scmp.eq.s32.totalorder %s1268_s14, 1 }
   0x8   : > { %s1650_s18 = scalar_select %p226_p1, %s1552_s11, %s228_s16  }
   0x9   : > { %p1652_p5 = por %p239_p2, %p238_p0  ;;  %p1656_p6 = por %p245_p4, %p244_p3 }
   0xa   : > { %p1271_p7 = scmp.ge.s32.totalorder %s1556_s12, 1  ;;  %p300_p8 = scmp.lt.s32.totalorder %s1556_s12, 3 }
   0xc   : > { %p301_p9 = pnand %p1271_p7, %p300_p8 }
   0xd   : > { %p341_p10 = scmp.lt.s32.totalorder (!%p301_p9), %s1635_s13, 1  ;;  %s1310_s14 = sshll.u32 (!%p301_p9), %s1635_s13, 8 }
   0xe   : > { %304 = sbr.rel (%p301_p9) target bundleno = 1212 (0x4bc), region = 56  ;;  %s1830_s23 = scalar_lea.hbm (!%p301_p9), %s1884_s9, %s1310_s14 }
   0xf   : > { %s1561_s24 = smov (!%p301_p9), [#allocation2]  }
  0x10   : > { %s1500_s25 = sshll.u32 (!%p301_p9), %s1561_s24, 4  ;;  %s1501_s25 = int_to_ptr.vmem [resolvable:$false] %s1500_s25 }
  0x13   : > { %v1558_v0 = vmov 0.0   ;;  %s342_s21 = scalar_select %p341_p10, %s1635_s13, 1  ;;  %vm1559_vm0 = vmmov 0   ;;  %v758_v1 = vld [vmem:[%s1881_s6] sm:$0xff]  ;;  %v760_v2 = vld [vmem:[%s1881_s6 + $0x10] sm:$0xff]  ;;  %v1560_v3 = vmov 0  }
  0x14   : > { %1343 = vmatprep.subr.bf16.mxu0 %v1558_v0  ;;  %1349 = vmatprep.subr.bf16.mxu1 %v1558_v0  ;;  %vm366_vm1 = vcmask 1041408   ;;  %v1479_v4 = vld [vmem:[%s1877_s2] sm:$0xff]   ;;  %v759_v11 = vld [vmem:[%s1881_s6 + $0x8] sm:$0xff]  ;;  %v761_v12 = vld [vmem:[%s1881_s6 + $0x18] sm:$0xff]  ;;  %vm362_vm2 = vcmask 31744   ;;  %vm818_vm3 = vcmask 523264  }
  0x15   : > { %1345 = vmatprep.mubr.msk.bf16.mxu0 %vm1559_vm0, %v1558_v0  ;;  %1351 = vmatprep.mubr.msk.bf16.mxu1 %vm1559_vm0, %v1558_v0  ;;  %s1308_s26 = sshll.u32 %s342_s21, 3  ;;  %v354_v13 = vld [vmem:[%s1878_s3] sm:$0xf]  ;;  %v731_v16 = vld [vmem:[%s1880_s5 + $0x8] sm:$0xff]  ;;  %v732_v22 = vld [vmem:[%s1880_s5 + $0x10] sm:$0xff]  ;;  %vm880_vm4 = vcmask 261120  }
  0x16   : > { %1478 = vset.pattern.permute.xlu1 %v1560_v3  ;;  %1477 = vset.pattern.permute.xlu0 %v1560_v3  ;;  %s1679_s29 = scalar_lea.vmem %s1875_s0, %s1308_s26  ;;  %s1684_s17 = scalar_lea.vmem %s1876_s1, %s1308_s26  ;;  %v730_v17 = vld [vmem:[%s1880_s5] sm:$0xff]  ;;  %v733_v23 = vld [vmem:[%s1880_s5 + $0x18] sm:$0xff]  ;;  %vm996_vm5 = vcmask 1043456   ;;  %vm992_vm6 = vcmask 64512   ;;  %vm1040_vm7 = vcmask 519168  }
  0x17   : > { %764 = vperm.xlu1 %1478, %v758_v1   ;;  %774 = vperm.xlu0 %1477, %v760_v2   ;;  %v355_v5 = vld [vmem:[%s1679_s29] sm:$0x3]  ;;  %v1280_v7 = vld [vmem:[%s1679_s29 + $0x2] sm:$0x3]  ;;  %v1284_v18 = vld [vmem:[%s1679_s29 + $0x4] sm:$0x3] }
  0x18   : > { %v356_v6 = vld [vmem:[%s1684_s17] sm:$0x3]  ;;  %v368_v8 = vsel %vm366_vm1, %v355_v5, 0  ;;  %v1281_v10 = vld [vmem:[%s1684_s17 + $0x2] sm:$0x3]  ;;  %v462_v14 = vsel %vm366_vm1, %v1280_v7, 0 }
  0x19   : > { %v415_v9 = vsel %vm366_vm1, %v356_v6, 0  ;;  %1344 = vmatpush3.bf16.msra.mxu0 %v368_v8  ;;  %v506_v15 = vsel %vm366_vm1, %v1281_v10, 0  ;;  %v1285_v19 = vld [vmem:[%s1684_s17 + $0x4] sm:$0x3]  ;;  %v553_v20 = vsel %vm366_vm1, %v1284_v18, 0  ;;  %s1502_s26 = scalar_lea.vmem %s1501_s25, 512 }
  0x1a   : > { %1350 = vmatpush3.bf16.msra.mxu1 %v415_v9  ;;  %1355 = vmatprep.subr.bf16.mxu0 %v1558_v0  ;;  %v597_v21 = vsel %vm366_vm1, %v1285_v19, 0  ;;  %v1288_v24 = vld [vmem:[%s1679_s29 + $0x6] sm:$0x3]  ;;  %s338_s29 = sand.u32 1, %s1548_s10  }
  0x1b   : > { %1361 = vmatprep.subr.bf16.mxu1 %v1558_v0  ;;  %769 = vperm.xlu1 %1478, %v759_v11   ;;  %v1289_v25 = vld [vmem:[%s1684_s17 + $0x6] sm:$0x3]  ;;  %v644_v26 = vsel %vm366_vm1, %v1288_v24, 0  ;;  %s1272_s17 = sshll.u32 %s338_s29, 4  ;;  %s1835_s13 = scalar_lea.sflag [#allocation3], %s338_s29 }
  0x1c   : > { %779 = vperm.xlu0 %1477, %v761_v12   ;;  %1346 = vmatmul.mubr.msk.bf16.vlgmr.msra.gmra.mxu0 %vm362_vm2, %v1479_v4  ;;  %v688_v27 = vsel %vm366_vm1, %v1289_v25, 0  ;;  %s340_s27 = scalar_lea.vmem [#allocation2], %s1272_s17 }
  0x1d   : > { %1352 = vmatmul.mubr.msk.bf16.vlgmr.msra.gmra.mxu1 %vm362_vm2, %v354_v13  ;;  %1356 = vmatpush3.bf16.msra.mxu0 %v462_v14  ;;  %s1194_s28 = sshll.u32 %s340_s27, 4  ;;  %s1825_s28 = int_to_ptr.vmem [resolvable:$true] %s1194_s28 }
  0x1e   : > { %1362 = vmatpush3.bf16.msra.mxu1 %v506_v15  ;;  %1357 = vmatprep.mubr.msk.bf16.mxu0 %vm1559_vm0, %v1558_v0  ;;  %s1496_s21 = scalar_lea.vmem %s1825_s28, 256  ;;  %p1503_p0 = scmp.lt.s32.totalorder %s1825_s28, %s1501_s25 }
  0x1f   : > { %1363 = vmatprep.mubr.msk.bf16.mxu1 %vm1559_vm0, %v1558_v0  ;;  %1367 = vmatprep.subr.bf16.mxu0 %v1558_v0  ;;  %p1497_p11 = scmp.ne.s32.totalorder %s1825_s28, %s1496_s21  ;;  %p1504_p1 = scmp.lt.s32.totalorder %s1502_s26, %s1496_s21 }
  0x20   : > { %1373 = vmatprep.subr.bf16.mxu1 %v1558_v0  ;;  %741 = vperm.xlu1 %1478, %v731_v16  }
  0x21   : > { %736 = vperm.xlu0 %1477, %v730_v17   ;;  %p1498_p12 = pnand %p1497_p11, %p1652_p5  ;;  %p1505_p2 = por %p1504_p1, %p1503_p0 }
  0x23   : > { %p1499_p13 = pneg %p1498_p12 }
  0x24   : > { %1358 = vmatmul.mubr.msk.bf16.vlgmr.msra.gmra.mxu0 %vm362_vm2, %v1479_v4  ;;  %751 = vperm.xlu1 %1478, %v733_v23  }
  0x25   : > { %1364 = vmatmul.mubr.msk.bf16.vlgmr.msra.gmra.mxu1 %vm362_vm2, %v354_v13  ;;  %1368 = vmatpush3.bf16.msra.mxu0 %v553_v20  ;;  %p1506_p3 = pnand %p1505_p2, %p1499_p13 }
  0x26   : > { %1374 = vmatpush3.bf16.msra.mxu1 %v597_v21  ;;  %1369 = vmatprep.mubr.msk.bf16.mxu0 %vm1559_vm0, %v1558_v0 }
  0x27   : > { %1375 = vmatprep.mubr.msk.bf16.mxu1 %vm1559_vm0, %v1558_v0  ;;  %1379 = vmatprep.subr.bf16.mxu0 %v1558_v0 }
  0x28   : > { %1385 = vmatprep.subr.bf16.mxu1 %v1558_v0  ;;  %746 = vperm.xlu0 %1477, %v732_v22  }
  0x2c   : > { %1370 = vmatmul.mubr.msk.bf16.vlgmr.msra.gmra.mxu0 %vm362_vm2, %v1479_v4 }
  0x2d   : > { %1376 = vmatmul.mubr.msk.bf16.vlgmr.msra.gmra.mxu1 %vm362_vm2, %v354_v13  ;;  %1380 = vmatpush3.bf16.msra.mxu0 %v644_v26 }
  0x2e   : > { %1386 = vmatpush3.bf16.msra.mxu1 %v688_v27  ;;  %1381 = vmatprep.mubr.msk.bf16.mxu0 %vm1559_vm0, %v1558_v0  ;;  %v788_v27 = vld [vmem:[%s1882_s7 + $0x10] sm:$0xff] }
  0x2f   : > { %1387 = vmatprep.mubr.msk.bf16.mxu1 %vm1559_vm0, %v1558_v0 }
  0x34   : > { %1382 = vmatmul.mubr.msk.bf16.vlgmr.msra.gmra.mxu0 %vm362_vm2, %v1479_v4 }
  0x35   : > { %1388 = vmatmul.mubr.msk.bf16.vlgmr.msra.gmra.mxu1 %vm362_vm2, %v354_v13 }
  0x92   : > { %v775_v28 = vpop.permute.xlu0 %774  ;;  %v765_v29 = vpop.permute.xlu1 %764 }
  0x96   : > { %v770_v33 = vpop.permute.xlu1 %769 }
  0x97   : > { %v780_v30 = vpop.permute.xlu0 %779 }
  0x9b   : > { %v742_v39 = vpop.permute.xlu1 %741 }
  0x9c   : > { %v737_v36 = vpop.permute.xlu0 %736 }
  0x9f   : > { %v752_v13 = vpop.permute.xlu1 %751 }
  0xa3   : > { %v747_v15 = vpop.permute.xlu0 %746 }
  0xdc   : > { %v404_v31 = vpop.f32.mrf.mxu0 }
  0xdd   : > { %v451_v32 = vpop.f32.mrf.mxu1  ;;  %v754_v42 = vadd.f32 %v737_v36, %v404_v31 }
  0xde   : > { %v1347_v34 = vpop.f32.mrf.mxu0  ;;  %v782_v5 = vadd.f32 %v765_v29, %v451_v32 }
  0xdf   : > { %v1353_v35 = vpop.f32.mrf.mxu1 }
  0xe0   : > { %v1752_v37 = vpop.f32.mrf.mxu0 }
  0xe1   : > { %v454_v38 = vpop.f32.mrf.mxu1 }
  0xe2   : > { %v1348_v40 = vpop.f32.mrf.mxu0 }
  0xe3   : > { %v1354_v41 = vpop.f32.mrf.mxu1 }
  0xe4   : > { %v498_v43 = vpop.f32.mrf.mxu0 }
  0xe5   : > { %v542_v44 = vpop.f32.mrf.mxu1  ;;  %v755_v45 = vadd.f32 %v742_v39, %v498_v43 }
  0xe6   : > { %v1359_v46 = vpop.f32.mrf.mxu0  ;;  %v783_v63 = vadd.f32 %v770_v33, %v542_v44 }
  0xe7   : > { %v1365_v47 = vpop.f32.mrf.mxu1  ;;  %v814_v48 = vpack.c.bf16 %v755_v45, %v754_v42 }
  0xe8   : > { %v1754_v49 = vpop.f32.mrf.mxu0  ;;  %v816_v9 = vpack.c.bf16 %v783_v63, %v782_v5 }
  0xe9   : > { %v545_v50 = vpop.f32.mrf.mxu1  ;;  %1395 = vmatprep.mubr.msk.bf16.mxu0 %vm818_vm3, %v814_v48 }
  0xea   : > { %v1360_v51 = vpop.f32.mrf.mxu0  ;;  %v826_v14 = vsel %vm818_vm3, %v816_v9, 0  ;;  %v786_v50 = vld [vmem:[%s1882_s7] sm:$0xff] }
  0xeb   : > { %v1366_v52 = vpop.f32.mrf.mxu1  ;;  %v787_v51 = vld [vmem:[%s1882_s7 + $0x8] sm:$0xff] }
  0xec   : > { %v589_v53 = vpop.f32.mrf.mxu0  ;;  %v789_v52 = vld [vmem:[%s1882_s7 + $0x18] sm:$0xff] }
  0xed   : > { %v633_v54 = vpop.f32.mrf.mxu1  ;;  %v756_v17 = vadd.f32 %v747_v15, %v589_v53  ;;  %v985_v53 = vld [vmem:[%s1883_s8] sm:$0xf] }
  0xee   : > { %v1371_v55 = vpop.f32.mrf.mxu0  ;;  %v784_v1 = vadd.f32 %v775_v28, %v633_v54 }
  0xef   : > { %v1377_v56 = vpop.f32.mrf.mxu1 }
  0xf0   : > { %v1757_v57 = vpop.f32.mrf.mxu0 }
  0xf1   : > { %v636_v58 = vpop.f32.mrf.mxu1 }
  0xf2   : > { %v1372_v59 = vpop.f32.mrf.mxu0 }
  0xf3   : > { %v1378_v60 = vpop.f32.mrf.mxu1 }
  0xf4   : > { %v680_v61 = vpop.f32.mrf.mxu0 }
  0xf5   : > { %v724_v62 = vpop.f32.mrf.mxu1  ;;  %v757_v16 = vadd.f32 %v752_v13, %v680_v61 }
  0xf6   : > { %v785_v2 = vadd.f32 %v780_v30, %v724_v62  ;;  %v1383_v4 = vpop.f32.mrf.mxu0 }
  0xf7   : > { %v1389_v3 = vpop.f32.mrf.mxu1  ;;  %v815_v18 = vpack.c.bf16 %v757_v16, %v756_v17 }
  0xf8   : > { %v817_v6 = vpack.c.bf16 %v785_v2, %v784_v1  ;;  %v1759_v8 = vpop.f32.mrf.mxu0 }
  0xf9   : > { %v727_v7 = vpop.f32.mrf.mxu1 }
  0xfa   : > { %1431 = vmatprep.subr.msk.bf16.mxu0 %vm818_vm3, %v817_v6  ;;  %v829_v10 = vsel %vm818_vm3, %v817_v6, 0  ;;  %v1384_v12 = vpop.f32.mrf.mxu0 }
  0xfb   : > { %v1390_v11 = vpop.f32.mrf.mxu1  ;;  %1392 = vmatpush3.bf16.xpose.msra.mxu0 %v829_v10 }
  0xfc   : > { %1432 = vmatprep.subr.msk.bf16.mxu0 %vm818_vm3, %v816_v9 }
 0x103   : > { %1394 = vmatpush3.bf16.xpose.msra.mxu0 %v826_v14 }
 0x104   : > { %1413 = vmatprep.subr.bf16.mxu0 %v1558_v0 }
 0x10a   : > { %1396 = vmatmul.mubr.msk.bf16.vlgmr.msra.gmra.mxu0 %vm818_vm3, %v815_v18 }
 0x10b   : > { %1415 = vmatprep.mubr.msk.bf16.mxu0 %vm1559_vm0, %v1558_v0 }
 0x1ca   : > { %v1397_v19 = vpop.f32.mrf.mxu0 }
 0x1cb   : > { %v887_v24 = vsel %vm880_vm4, %v1397_v19, -inf }
 0x1cc   : > { %v865_v20 = vpop.f32.mrf.mxu0 }
 0x1cd   : > { %v881_v21 = vsel %vm880_vm4, %v865_v20, -inf }
 0x1ce   : > { %882 = vmax.xlane.f32.xlu0 %v881_v21  ;;  %v1398_v22 = vpop.f32.mrf.mxu0 }
 0x1cf   : > { %v890_v26 = vsel %vm880_vm4, %v1398_v22, -inf }
 0x1d0   : > { %v868_v23 = vpop.f32.mrf.mxu0 }
 0x1d1   : > { %v884_v25 = vsel %vm880_vm4, %v868_v23, -inf }
 0x1d2   : > { %888 = vmax.xlane.f32.xlu0 %v887_v24  ;;  %885 = vmax.xlane.f32.xlu1 %v884_v25 }
 0x1d6   : > { %891 = vmax.xlane.f32.xlu0 %v890_v26 }
 0x1e3   : > { %802 = vperm.xlu1 %1478, %v788_v27  }
 0x257   : > { %v883_v28 = vpop.xlane.xlu0 %882 }
 0x258   : > { %v893_v29 = vsub.f32 %v865_v20, %v883_v28  ;;  %v984_v20 = vld [vmem:[%s1879_s4] sm:$0x3] }
 0x25a   : > { %v897_v33 = vmul.f32 1.442695, %v893_v29 }
 0x25b   : > { %v889_v30 = vpop.xlane.xlu0 %888  ;;  %v886_v31 = vpop.xlane.xlu1 %885 }
 0x25c   : > { %v895_v32 = vsub.f32 %v1397_v19, %v889_v30  ;;  %v894_v35 = vsub.f32 %v868_v23, %v886_v31 }
 0x25e   : > { %v901_v34 = vmul.f32 1.442695, %v895_v32  ;;  %v899_v39 = vmul.f32 1.442695, %v894_v35 }
 0x25f   : > { %v892_v36 = vpop.xlane.xlu0 %891  ;;  %v803_v54 = vpop.permute.xlu1 %802 }
 0x260   : > { %1480 = vpow2.f32 %v901_v34  ;;  %v896_v38 = vsub.f32 %v1398_v22, %v892_v36  ;;  %v812_v63 = vadd.f32 %v803_v54, %v1757_v57 }
 0x261   : > { %1482 = vpow2.f32 %v897_v33 }
 0x262   : > { %v903_v40 = vmul.f32 1.442695, %v896_v38 }
 0x264   : > { %1484 = vpow2.f32 %v903_v40 }
 0x265   : > { %1486 = vpow2.f32 %v899_v39 }
 0x26d   : > { %v1481_v41 = vpop.eup %1480 }
 0x26e   : > { %v911_v42 = vsel %vm880_vm4, %v1481_v41, 0.0  ;;  %v1483_v43 = vpop.eup %1482 }
 0x26f   : > { %912 = vadd.xlane.f32.xlu1 %v911_v42  ;;  %v905_v46 = vsel %vm880_vm4, %v1483_v43, 0.0 }
 0x271   : > { %v1485_v44 = vpop.eup %1484 }
 0x272   : > { %v914_v45 = vsel %vm880_vm4, %v1485_v44, 0.0  ;;  %v1487_v47 = vpop.eup %1486 }
 0x273   : > { %915 = vadd.xlane.f32.xlu0 %v914_v45  ;;  %906 = vadd.xlane.f32.xlu1 %v905_v46  ;;  %v908_v48 = vsel %vm880_vm4, %v1487_v47, 0.0 }
 0x277   : > { %909 = vadd.xlane.f32.xlu0 %v908_v48 }
 0x284   : > { %792 = vperm.xlu1 %1478, %v786_v50  }
 0x288   : > { %797 = vperm.xlu1 %1478, %v787_v51  }
 0x28d   : > { %807 = vperm.xlu0 %1477, %v789_v52  }
 0x291   : > { %988 = vperm.xlu0 %1477, %v985_v53  }
 0x2f8   : > { %v913_v55 = vpop.xlane.xlu1 %912 }
 0x2fc   : > { %v916_v56 = vpop.xlane.xlu0 %915  ;;  %v907_v58 = vpop.xlane.xlu1 %906 }
 0x2fd   : > { %1488 = vrcp.f32 %v916_v56 }
 0x2fe   : > { %1490 = vrcp.f32 %v907_v58 }
 0x2ff   : > { %1492 = vrcp.f32 %v913_v55 }
 0x300   : > { %v910_v59 = vpop.xlane.xlu0 %909  ;;  %v793_v60 = vpop.permute.xlu1 %792 }
 0x301   : > { %1494 = vrcp.f32 %v910_v59  ;;  %v810_v4 = vadd.f32 %v793_v60, %v1752_v37 }
 0x304   : > { %v798_v61 = vpop.permute.xlu1 %797 }
 0x305   : > { %v811_v1 = vadd.f32 %v798_v61, %v1754_v49 }
 0x307   : > { %v927_v9 = vpack.c.bf16 %v811_v1, %v810_v4 }
 0x308   : > { %v808_v62 = vpop.permute.xlu0 %807 }
 0x309   : > { %v813_v2 = vadd.f32 %v808_v62, %v1759_v8 }
 0x30a   : > { %v1489_v3 = vpop.eup %1488 }
 0x30b   : > { %v928_v5 = vpack.c.bf16 %v813_v2, %v812_v63  ;;  %v1491_v6 = vpop.eup %1490  ;;  %v924_v13 = vmul.f32 %v1489_v3, %v1485_v44 }
 0x30c   : > { %v1493_v7 = vpop.eup %1492  ;;  %v921_v11 = vmul.f32 %v1491_v6, %v1483_v43  ;;  %v989_v26 = vpop.permute.xlu0 %988 }
 0x30d   : > { %1399 = vmatprep.subr.bf16.mxu1 %v928_v5  ;;  %v923_v57 = vmul.f32 %v1493_v7, %v1481_v41 }
 0x30e   : > { %v1495_v10 = vpop.eup %1494  ;;  %1400 = vmatpush3.bf16.msra.mxu1 %v928_v5 }
 0x30f   : > { %1401 = vmatprep.subr.bf16.mxu1 %v927_v9  ;;  %v922_v12 = vmul.f32 %v1495_v10, %v1487_v47  ;;  %v926_v49 = vpack.c.bf16 %v924_v13, %v923_v57 }
 0x311   : > { %v925_v14 = vpack.c.bf16 %v922_v12, %v921_v11 }
 0x312   : > { %1402 = vmatpush3.bf16.msra.mxu1 %v927_v9 }
 0x313   : > { %1403 = vmatprep.mubr.msk.bf16.mxu1 %vm880_vm4, %v925_v14  ;;  %1407 = vmatprep.subr.bf16.mxu1 %v1558_v0 }
 0x315   : > { %1404 = vmatmul.mubr.msk.bf16.vlgmr.msra.gmra.mxu1 %vm880_vm4, %v926_v49 }
 0x316   : > { %1409 = vmatprep.mubr.msk.bf16.mxu1 %vm1559_vm0, %v1558_v0 }
 0x3d5   : > { %v1405_v37 = vpop.f32.mrf.mxu1 }
 0x3d6   : > { %v1088_v17 = vpack.c.bf16 %v1405_v37, %v1405_v37 }
 0x3d7   : > { %v969_v8 = vpop.f32.mrf.mxu1 }
 0x3d8   : > { %v991_v15 = vpack.c.bf16 %v969_v8, %v969_v8  ;;  %v1090_v22 = vsel %vm996_vm5, %v1088_v17, 0 }
 0x3d9   : > { %v1406_v16 = vpop.f32.mrf.mxu1 }
 0x3da   : > { %v998_v18 = vsel %vm996_vm5, %v991_v15, 0  ;;  %v1134_v23 = vpack.c.bf16 %v1406_v16, %v1406_v16 }
 0x3db   : > { %v972_v19 = vpop.f32.mrf.mxu1  ;;  %1408 = vmatpush3.bf16.msra.mxu1 %v998_v18 }
 0x3dc   : > { %v1042_v21 = vpack.c.bf16 %v972_v19, %v972_v19  ;;  %1419 = vmatprep.subr.bf16.mxu1 %v1558_v0  ;;  %v1136_v25 = vsel %vm996_vm5, %v1134_v23, 0 }
 0x3de   : > { %v1044_v24 = vsel %vm996_vm5, %v1042_v21, 0  ;;  %1410 = vmatmul.mubr.msk.bf16.vlgmr.msra.gmra.mxu1 %vm992_vm6, %v984_v20 }
 0x3df   : > { %1414 = vmatpush3.bf16.msra.mxu0 %v1044_v24  ;;  %1420 = vmatpush3.bf16.msra.mxu1 %v1090_v22 }
 0x3e0   : > { %1425 = vmatprep.subr.bf16.mxu0 %v1558_v0  ;;  %1421 = vmatprep.mubr.msk.bf16.mxu1 %vm1559_vm0, %v1558_v0 }
 0x3e2   : > { %1416 = vmatmul.mubr.msk.bf16.vlgmr.msra.gmra.mxu0 %vm992_vm6, %v984_v20 }
 0x3e3   : > { %1426 = vmatpush3.bf16.msra.mxu0 %v1136_v25  ;;  %1427 = vmatprep.mubr.msk.bf16.mxu0 %vm1559_vm0, %v1558_v0 }
 0x3e6   : > { %1422 = vmatmul.mubr.msk.bf16.vlgmr.msra.gmra.mxu1 %vm992_vm6, %v984_v20 }
 0x3ea   : > { %1428 = vmatmul.mubr.msk.bf16.vlgmr.msra.gmra.mxu0 %vm992_vm6, %v984_v20 }
 0x49e   : > { %v1034_v27 = vpop.f32.mrf.mxu1 }
 0x49f   : > { %v1035_v28 = vadd.f32 %v1034_v27, %v989_v26 }
 0x4a0   : > { %v1411_v29 = vpop.f32.mrf.mxu1 }
 0x4a1   : > { %1041 = vst.msk [vmem:[%s340_s27] sm:$0xf] %vm1040_vm7, %v1035_v28 }
 0x4a2   : > { %v1037_v30 = vpop.f32.mrf.mxu1  ;;  %v1080_v31 = vpop.f32.mrf.mxu0 }
 0x4a3   : > { %v1081_v32 = vadd.f32 %v1080_v31, %v989_v26 }
 0x4a4   : > { %v1412_v0 = vpop.f32.mrf.mxu1  ;;  %v1417_v33 = vpop.f32.mrf.mxu0 }
 0x4a5   : > { %1298 = vst.msk [vmem:[%s340_s27 + $0x4] sm:$0xf] %vm1040_vm7, %v1081_v32 }
 0x4a6   : > { %v1083_v34 = vpop.f32.mrf.mxu0  ;;  %v1126_v35 = vpop.f32.mrf.mxu1 }
 0x4a7   : > { %v1127_v36 = vadd.f32 %v1126_v35, %v989_v26 }
 0x4a8   : > { %v1418_v38 = vpop.f32.mrf.mxu0  ;;  %v1423_v39 = vpop.f32.mrf.mxu1 }
 0x4a9   : > { %1300 = vst.msk [vmem:[%s340_s27 + $0x8] sm:$0xf] %vm1040_vm7, %v1127_v36 }
 0x4aa   : > { %v1172_v40 = vpop.f32.mrf.mxu0  ;;  %v1129_v41 = vpop.f32.mrf.mxu1 }
 0x4ab   : > { %v1173_v42 = vadd.f32 %v1172_v40, %v989_v26 }
 0x4ac   : > { %v1429_v43 = vpop.f32.mrf.mxu0  ;;  %v1424_v44 = vpop.f32.mrf.mxu1 }
 0x4ad   : > { %1302 = vst.msk [vmem:[%s340_s27 + $0xc] sm:$0xf] %vm1040_vm7, %v1173_v42 }
 0x4ae   : > { %v1175_v45 = vpop.f32.mrf.mxu0 }
 0x4af   : > { %1509 = shalt.err (!%p1506_p3)
}
 0x4b0   : > { %s1510_s29 = scalar_lea.hbm %s1830_s23, 256  ;;  %s1514_s14 = scalar_lea.hbm %s1884_s9, 512 }
 0x4b1   : > { %p1511_p4 = scmp.ne.s32.totalorder %s1830_s23, %s1510_s29  ;;  %p1515_p9 = scmp.lt.s32.totalorder %s1830_s23, %s1884_s9 }
 0x4b2   : > { %p1516_p10 = scmp.lt.s32.totalorder %s1514_s14, %s1510_s29 }
 0x4b3   : > { %p1512_p7 = pnand %p1511_p4, %p1652_p5 }
 0x4b4   : > { %p1517_p11 = por %p1516_p10, %p1515_p9 }
 0x4b5   : > { %p1513_p8 = pneg %p1512_p7 }
 0x4b7   : > { %p1518_p12 = pnand %p1517_p11, %p1513_p8 }
 0x4b9   : > { %1521 = shalt.err (!%p1518_p12)
}
 0x4ba   : > { %s1562_s21 = smov 64   ;;  %s1563_s24 = smov 4   ;;  %v1430_v46 = vpop.f32.mrf.mxu0 }
 0x4bb   : > { %1433 = dma.vmem_to_hbm [thread:$0]  (%p1652_p5), %s1825_s28, 256, %s1830_s23, %s1835_s13, %s1562_s21, %s1562_s21, %s1563_s24  }
 0x4bc PF: > { %p1439_p13 = scmp.ge.s32.totalorder %s1556_s12, 2  ;;  %s1209_s25 = sand.u32 1, %s1544_s30  }
 0x4bd   : > { %s1210_s26 = scalar_lea.sflag [#allocation3], %s1209_s25 }
 0x4be   : > { %p1436_p0 = pnand %p1439_p13, %p1656_p6 }
 0x4c0   : > { %p1437_p1 = pneg %p1436_p0 }
 0x4c2   : > { %1539 = dma.done.wait (%p1437_p1), %s1210_s26, 256  }
 0x4c3   : > { %1541 = vsyncadd (%p1437_p1), %s1210_s26, 4294967040  ;;  %p19_p2 = scmp.ge.s32.totalorder %s1639_s15, 4   ;;  %s1887_s30 = smov %s1548_s10 }
 0x4c4   : > { %s1888_s10 = smov %s1552_s11  ;;  %s1889_s11 = smov %s1650_s18 }
 0x4c5   : > { %s1890_s12 = smov %s1639_s15  ;;  %21 = sbr.rel (!%p19_p2) target bundleno = 3 (0x3), region = 103 }
 0x4ca   :  { %1215 = vsyncpa [#allocation3], 1 }
 0x4cb   :  { %1217 = vsyncpa [#allocation3 + $0x1], 1 }

</bundles_post_ra>
